<compile_context>
chip_gen: v6e
topology: v6e:2x2x1
jax: 0.10.0
libtpu: 0.0.40
codegen_flags: <defaults>
</compile_context>

<pallas_src>
import functools

import jax
import jax.numpy as jnp
from jax.experimental import pallas as pl
from jax.experimental.pallas import tpu as pltpu


def _round_up(x, m):
    return ((x + m - 1) // m) * m


def _largest_aligned_divisor(full, desired, align):
    """Largest multiple of `align` that divides `full` (itself a multiple of
    `align`) and does not exceed max(desired rounded down to align, align)."""
    desired = max(align, (desired // align) * align)
    units = full // align
    best = 1
    for d in range(1, units + 1):
        if units % d == 0 and d * align <= desired:
            best = d
    return best * align


def _pin_filler_k(k, v, lo_ref, hi_ref):
    # Filler visits (empty row range: lo == hi) pin the K block index to 0 so
    # the software pipeline never re-streams x / weight slabs for them.
    return k * (lo_ref[v] < hi_ref[v]).astype(jnp.int32)


def _multiresnet_linear_kernel(tm, single_k, gid_ref, tid_ref, lo_ref, hi_ref,
                               x_ref, w_ref, b_ref, o_ref, acc_ref=None):
    # Grid: (n, visit, k)  ->  n "parallel" (v7x megacore), visit/k "arbitrary".
    # gid/tid/lo/hi : SMEM (V,) int32 scalar-prefetch visit schedule
    # x_ref  : VMEM (TM, TK)      sorted input rows of the visited tile
    # w_ref  : VMEM (1, TK, TN)   gathered transposed weight (K, N) slab
    # b_ref  : VMEM (1, 1, TN)    gathered bias slice
    # o_ref  : VMEM (TM, TN)      output tile (resident across visits of a tile)
    # acc_ref: VMEM (TM, TN) f32  K accumulator (only when nk > 1)
    del gid_ref  # only used by the index_maps
    v = pl.program_id(1)
    k = pl.program_id(2)
    nk = pl.num_programs(2)

    lo = lo_ref[v]
    hi = hi_ref[v]
    tile = tid_ref[v]

    @pl.when(lo < hi)                       # skip filler visits entirely
    def _():
        prod = jnp.dot(x_ref[...], w_ref[0],
                       preferred_element_type=jnp.float32)

        def epilogue(y):
            tile_lo = tile * tm
            straddled = (lo > tile_lo) | (hi < tile_lo + tm)

            @pl.when(straddled)
            def _():
                # The output block stays resident in VMEM across the
                # consecutive visits of a straddled tile (visit axis is
                # sequential); rows outside the current group keep the value
                # written by their own group's visit.  Every real row is
                # written exactly once.
                rows = tile_lo + jax.lax.broadcasted_iota(jnp.int32, (tm, 1), 0)
                in_group = (rows >= lo) & (rows < hi)
                o_ref[...] = jnp.where(in_group, y, o_ref[...])

            @pl.when(jnp.logical_not(straddled))
            def _():
                o_ref[...] = y               # plain unmasked lane-dense store

        if single_k:
            # nk == 1: no accumulator scratch, single fused dot + bias + store.
            epilogue(prod + b_ref[0])
        else:
            @pl.when(k == 0)
            def _():
                acc_ref[...] = prod          # no zero-fill pass

            @pl.when(k > 0)
            def _():
                acc_ref[...] += prod

            @pl.when(k == nk - 1)
            def _():
                epilogue(acc_ref[...] + b_ref[0])


def multiresnet_linear(inputs, indices, weights, biases, *,
                       tm=256, tk=512, tn=512,
                       compute_dtype=jnp.float32,
                       vmem_limit_bytes=None):
    """inputs (B, In) f32, indices (B,) int, weights (M, Out, In) f32,
    biases (M, Out) f32 -> (B, Out) f32.

    compute_dtype=jnp.bfloat16 casts x / weights for the MXU (f32 accumulation
    kept) — ~2-4x on v6e/v7x at a small accuracy cost vs. PyTorch f32."""
    batch, in_features = inputs.shape
    num_models, out_features, _ = weights.shape

    # ---------------- wrapper-side prep (plain JAX / XLA) -----------------
    indices = jnp.clip(indices.astype(jnp.int32), 0, num_models - 1)

    # Row tile: >= 8 sublanes, no larger than the (padded) batch.
    tm = max(8, min(_round_up(tm, 8), _round_up(batch, 8)))
    b_pad = _round_up(batch, tm)
    num_tiles = b_pad // tm

    # K tiling: either full-K when it already fits the requested tile, or a
    # 128-multiple TK dividing the 128-padded K — never a huge full-K slab.
    if in_features <= max(128, (tk // 128) * 128):
        tk = in_features
        k_pad = in_features
    else:
        k_pad = _round_up(in_features, 128)
        tk = _largest_aligned_divisor(k_pad, tk, 128)
    nk = k_pad // tk

    # N tiling (lane axis): pad Out to a 128 multiple for unmasked stores.
    out_pad = _round_up(out_features, 128)
    tn = _largest_aligned_divisor(out_pad, tn, 128)
    nn = out_pad // tn

    # Sort rows so equal indices are adjacent (weight reuse); pad rows to TM.
    order = jnp.argsort(indices)
    inv = jnp.argsort(order)                  # inverse permutation (gather back)
    x_sorted = inputs[order]
    idx_sorted = indices[order]
    if b_pad > batch:
        x_sorted = jnp.pad(x_sorted, ((0, b_pad - batch), (0, 0)))
        idx_sorted = jnp.pad(idx_sorted, (0, b_pad - batch), mode="edge")
    if k_pad > in_features:
        x_sorted = jnp.pad(x_sorted, ((0, 0), (0, k_pad - in_features)))

    # One-time transpose: (M, In, Out) puts out_features on the lane axis.
    w_t = jnp.transpose(weights, (0, 2, 1))
    if k_pad > in_features or out_pad > out_features:
        w_t = jnp.pad(w_t, ((0, 0),
                            (0, k_pad - in_features),
                            (0, out_pad - out_features)))
    b3 = biases.reshape(num_models, 1, out_features)
    if out_pad > out_features:
        b3 = jnp.pad(b3, ((0, 0), (0, 0), (0, out_pad - out_features)))

    x_sorted = x_sorted.astype(compute_dtype)
    w_t = w_t.astype(compute_dtype)

    # Visit schedule: one visit per contiguous (row-tile, group) run of the
    # sorted rows.  Trailing unused slots become empty (skipped) filler visits.
    v_max = max(1, min(num_tiles + num_models - 1, b_pad))
    rows = jnp.arange(b_pad, dtype=jnp.int32)
    run_key = (rows // tm) * num_models + idx_sorted
    starts = jnp.concatenate(
        [jnp.ones((1,), dtype=bool), run_key[1:] != run_key[:-1]])
    num_runs = jnp.sum(starts.astype(jnp.int32))
    run_rows = jnp.where(starts, size=v_max, fill_value=0)[0].astype(jnp.int32)
    vidx = jnp.arange(v_max, dtype=jnp.int32)
    valid = vidx < num_runs
    last_start = run_rows[num_runs - 1]
    row_lo = jnp.where(valid, run_rows, last_start).astype(jnp.int32)
    next_start = jnp.concatenate(
        [run_rows[1:], jnp.array([b_pad], dtype=jnp.int32)])
    row_hi = jnp.where(vidx < num_runs - 1, next_start, b_pad).astype(jnp.int32)
    row_hi = jnp.where(valid, row_hi, row_lo)       # fillers: empty row range
    group_ids = idx_sorted[row_lo].astype(jnp.int32)
    tile_ids = (row_lo // tm).astype(jnp.int32)

    # VMEM budget from the actual (double-buffered) block sizes.
    xw_bytes = jnp.dtype(compute_dtype).itemsize
    est = (2 * tm * tk * xw_bytes          # x (double-buffered)
           + 2 * tk * tn * xw_bytes        # weight slab
           + 2 * tn * 4                    # bias
           + 2 * tm * tn * 4               # output block
           + (0 if nk == 1 else tm * tn * 4))  # f32 accumulator scratch
    if vmem_limit_bytes is None:
        vmem_limit_bytes = int(min(64 << 20, max(32 << 20, 2 * est)))

    kernel = functools.partial(_multiresnet_linear_kernel, tm, nk == 1)
    scratch = [] if nk == 1 else [pltpu.VMEM((tm, tn), jnp.float32)]

    out_sorted = pl.pallas_call(
        kernel,
        out_shape=jax.ShapeDtypeStruct((b_pad, out_pad), jnp.float32),
        grid_spec=pltpu.PrefetchScalarGridSpec(
            num_scalar_prefetch=4,
            grid=(nn, v_max, nk),
            in_specs=[
                # sorted input rows of the visited tile
                pl.BlockSpec((tm, tk),
                             lambda n, v, k, g, t, lo, hi:
                                 (t[v], _pin_filler_k(k, v, lo, hi))),
                # gathered transposed weight (K, N) slab of the visited group
                pl.BlockSpec((1, tk, tn),
                             lambda n, v, k, g, t, lo, hi:
                                 (g[v], _pin_filler_k(k, v, lo, hi), n)),
                # gathered bias slice
                pl.BlockSpec((1, 1, tn),
                             lambda n, v, k, g, t, lo, hi: (g[v], 0, n)),
            ],
            out_specs=pl.BlockSpec((tm, tn),
                                   lambda n, v, k, g, t, lo, hi: (t[v], n)),
            scratch_shapes=scratch,
        ),
        compiler_params=pltpu.CompilerParams(
            # N axis is the only safe parallel axis (v7x megacore); the visit
            # axis MUST stay sequential because straddled tiles read-modify-
            # write their resident output block across consecutive visits.
            dimension_semantics=("parallel", "arbitrary", "arbitrary"),
            vmem_limit_bytes=int(vmem_limit_bytes)),
    )(group_ids, tile_ids, row_lo, row_hi, x_sorted, w_t, b3)

    # Un-permute with a gather by the inverse permutation; drop padding.
    out = out_sorted[inv]
    if out_pad > out_features:
        out = out[:, :out_features]
    return out


if __name__ == "__main__":
    # Small, deterministic setup consistent with the module's __init__.
    num_models = 4
    in_features = 32
    out_features = 32
    batch = 16

    key = jax.random.PRNGKey(0)
    kw, kb, kx, ki = jax.random.split(key, 4)

    sqrt_k = jnp.sqrt(1.0 / num_models)
    weights = jax.random.uniform(
        kw, (num_models, out_features, in_features), dtype=jnp.float32,
        minval=-sqrt_k, maxval=sqrt_k)
    biases = jax.random.uniform(
        kb, (num_models, out_features), dtype=jnp.float32,
        minval=-sqrt_k, maxval=sqrt_k)
    inputs = jax.random.normal(kx, (batch, in_features), dtype=jnp.float32)
    indices = jax.random.randint(ki, (batch,), 0, num_models, dtype=jnp.int32)

    # Pure-JAX reference (mirrors the PyTorch forward exactly).
    def ref(x, idx, w, b):
        return jnp.matmul(w[idx], x[:, :, None])[:, :, 0] + b[idx]

    # Case 1: single-K / single-N fast path.
    y = jax.block_until_ready(multiresnet_linear(inputs, indices, weights, biases))
    assert y.shape == (batch, out_features)
    assert jnp.allclose(y, ref(inputs, indices, weights, biases),
                        atol=1e-4, rtol=1e-4), "mismatch vs reference"

    # Case 2: odd batch -> row padding, straddled tiles, filler visits.
    batch2 = 5
    inputs2 = jax.random.normal(jax.random.PRNGKey(1), (batch2, in_features),
                                dtype=jnp.float32)
    indices2 = jnp.array([2, 0, 2, 1, 2], dtype=jnp.int32)
    y2 = jax.block_until_ready(
        multiresnet_linear(inputs2, indices2, weights, biases))
    assert jnp.allclose(y2, ref(inputs2, indices2, weights, biases),
                        atol=1e-4, rtol=1e-4), "mismatch (padded case)"

    # Case 3: multi-K accumulation and multi-N tiling (still small shapes).
    num_models3, in3, out3, batch3 = 3, 384, 384, 48
    k3 = jax.random.split(jax.random.PRNGKey(2), 4)
    s3 = jnp.sqrt(1.0 / num_models3)
    w3 = jax.random.uniform(k3[0], (num_models3, out3, in3), dtype=jnp.float32,
                            minval=-s3, maxval=s3)
    b3_ = jax.random.uniform(k3[1], (num_models3, out3), dtype=jnp.float32,
                             minval=-s3, maxval=s3)
    x3 = jax.random.normal(k3[2], (batch3, in3), dtype=jnp.float32)
    i3 = jax.random.randint(k3[3], (batch3,), 0, num_models3, dtype=jnp.int32)
    y3 = jax.block_until_ready(
        multiresnet_linear(x3, i3, w3, b3_, tm=16, tk=128, tn=128))
    assert jnp.allclose(y3, ref(x3, i3, w3, b3_),
                        atol=2e-4, rtol=2e-4), "mismatch (tiled K/N case)"

    # Case 4: optional bf16 compute path (f32 accumulation) — loose tolerance.
    y_bf16 = jax.block_until_ready(
        multiresnet_linear(inputs, indices, weights, biases,
                           compute_dtype=jnp.bfloat16))
    assert jnp.allclose(y_bf16, ref(inputs, indices, weights, biases),
                        atol=2e-1, rtol=2e-1), "mismatch (bf16 path)"

    print("KERNEL_OK")
</pallas_src>

<mosaic_0001>
module attributes {stable_mosaic.version = 11 : i64} {
  func.func @_multiresnet_linear_kernel(%arg0: i32, %arg1: i32, %arg2: i32, %arg3: memref<4xi32, #tpu.memory_space<smem>>, %arg4: memref<4xi32, #tpu.memory_space<smem>>, %arg5: memref<4xi32, #tpu.memory_space<smem>>, %arg6: memref<4xi32, #tpu.memory_space<smem>>, %arg7: memref<16x32xf32, #tpu.memory_space<vmem>>, %arg8: memref<1x32x128xf32, #tpu.memory_space<vmem>>, %arg9: memref<1x1x128xf32, #tpu.memory_space<vmem>>, %arg10: memref<16x128xf32, #tpu.memory_space<vmem>>) attributes {dimension_semantics = [#tpu.dimension_semantics<parallel>, #tpu.dimension_semantics<arbitrary>, #tpu.dimension_semantics<arbitrary>], iteration_bounds = array<i64: 1, 4, 1>, scalar_prefetch = 4 : i64, scratch_operands = 0 : i64, tpu.core_type = #tpu.core_type<tc>, window_params = [{transform_indices = @transform_0, window_bounds = array<i64: 16, 32>}, {transform_indices = @transform_1, window_bounds = array<i64: 1, 32, 128>}, {transform_indices = @transform_2, window_bounds = array<i64: 1, 1, 128>}, {transform_indices = @transform_3, window_bounds = array<i64: 16, 128>}]} {
    %0 = arith.index_cast %arg1 : i32 to index
    %1 = memref.load %arg5[%0] : memref<4xi32, #tpu.memory_space<smem>>
    %2 = arith.index_cast %arg1 : i32 to index
    %3 = memref.load %arg6[%2] : memref<4xi32, #tpu.memory_space<smem>>
    %4 = arith.index_cast %arg1 : i32 to index
    %5 = memref.load %arg4[%4] : memref<4xi32, #tpu.memory_space<smem>>
    %6 = arith.cmpi slt, %1, %3 : i32
    %7 = arith.extui %6 : i1 to i32
    %c0_i32 = arith.constant 0 : i32
    %8 = arith.cmpi ne, %7, %c0_i32 : i32
    scf.if %8 {
      %c0 = arith.constant 0 : index
      %c0_0 = arith.constant 0 : index
      %9 = vector.load %arg7[%c0, %c0_0] : memref<16x32xf32, #tpu.memory_space<vmem>>, vector<16x32xf32>
      %c0_1 = arith.constant 0 : index
      %c0_2 = arith.constant 0 : index
      %c0_3 = arith.constant 0 : index
      %10 = vector.load %arg8[%c0_1, %c0_2, %c0_3] : memref<1x32x128xf32, #tpu.memory_space<vmem>>, vector<1x32x128xf32>
      %11 = vector.shape_cast %10 : vector<1x32x128xf32> to vector<32x128xf32>
      %cst = arith.constant dense<0.000000e+00> : vector<16x128xf32>
      %12 = tpu.matmul %9, %11, %cst {dimension_numbers = #tpu.dot_dimension_numbers<[1], [0], [0], [1], [0, 0, 1, 1], [], []>} : vector<16x32xf32>, vector<32x128xf32>, vector<16x128xf32> -> vector<16x128xf32>
      %c0_4 = arith.constant 0 : index
      %c0_5 = arith.constant 0 : index
      %c0_6 = arith.constant 0 : index
      %13 = vector.load %arg9[%c0_4, %c0_5, %c0_6] : memref<1x1x128xf32, #tpu.memory_space<vmem>>, vector<1x1x128xf32>
      %14 = vector.shape_cast %13 : vector<1x1x128xf32> to vector<1x128xf32>
      %15 = vector.broadcast %14 : vector<1x128xf32> to vector<16x128xf32>
      %16 = arith.addf %12, %15 : vector<16x128xf32>
      %c16_i32 = arith.constant 16 : i32
      %17 = arith.muli %5, %c16_i32 : i32
      %18 = arith.cmpi sgt, %1, %17 : i32
      %c16_i32_7 = arith.constant 16 : i32
      %19 = arith.addi %17, %c16_i32_7 : i32
      %20 = arith.cmpi slt, %3, %19 : i32
      %21 = arith.ori %18, %20 : i1
      %22 = arith.extui %21 : i1 to i32
      %c0_i32_8 = arith.constant 0 : i32
      %23 = arith.cmpi ne, %22, %c0_i32_8 : i32
      scf.if %23 {
        %27 = tpu.iota {dimensions = array<i32: 0>} : vector<16x1xi32>
        %28 = vector.broadcast %17 : i32 to vector<16x1xi32>
        %29 = arith.addi %28, %27 : vector<16x1xi32>
        %30 = vector.broadcast %1 : i32 to vector<16x1xi32>
        %31 = arith.cmpi sge, %29, %30 : vector<16x1xi32>
        %32 = vector.broadcast %3 : i32 to vector<16x1xi32>
        %33 = arith.cmpi slt, %29, %32 : vector<16x1xi32>
        %34 = arith.andi %31, %33 : vector<16x1xi1>
        %c0_10 = arith.constant 0 : index
        %c0_11 = arith.constant 0 : index
        %35 = vector.load %arg10[%c0_10, %c0_11] : memref<16x128xf32, #tpu.memory_space<vmem>>, vector<16x128xf32>
        %36 = vector.shape_cast %34 : vector<16x1xi1> to vector<16x1xi1>
        %37 = vector.broadcast %36 : vector<16x1xi1> to vector<16x128xi1>
        %38 = arith.select %37, %16, %35 : vector<16x128xi1>, vector<16x128xf32>
        %c0_12 = arith.constant 0 : index
        %c0_13 = arith.constant 0 : index
        %39 = vector.load %arg10[%c0_12, %c0_13] : memref<16x128xf32, #tpu.memory_space<vmem>>, vector<16x128xf32>
        tpu.vector_store %arg10[%c0_12, %c0_13], %38 {strides = array<i32>} : memref<16x128xf32, #tpu.memory_space<vmem>>, vector<16x128xf32>,
      } else {
      }
      %true = arith.constant true
      %24 = arith.xori %21, %true : i1
      %25 = arith.extui %24 : i1 to i32
      %c0_i32_9 = arith.constant 0 : i32
      %26 = arith.cmpi ne, %25, %c0_i32_9 : i32
      scf.if %26 {
        %c0_10 = arith.constant 0 : index
        %c0_11 = arith.constant 0 : index
        %27 = vector.load %arg10[%c0_10, %c0_11] : memref<16x128xf32, #tpu.memory_space<vmem>>, vector<16x128xf32>
        tpu.vector_store %arg10[%c0_10, %c0_11], %16 {strides = array<i32>} : memref<16x128xf32, #tpu.memory_space<vmem>>, vector<16x128xf32>,
      } else {
      }
    } else {
    }
    return
  }
  func.func @transform_0(%arg0: i32, %arg1: i32, %arg2: i32, %arg3: memref<4xi32, #tpu.memory_space<smem>>, %arg4: memref<4xi32, #tpu.memory_space<smem>>, %arg5: memref<4xi32, #tpu.memory_space<smem>>, %arg6: memref<4xi32, #tpu.memory_space<smem>>) -> (i32, i32) {
    %0 = arith.index_cast %arg1 : i32 to index
    %1 = memref.load %arg4[%0] : memref<4xi32, #tpu.memory_space<smem>>
    %2 = arith.index_cast %arg1 : i32 to index
    %3 = memref.load %arg5[%2] : memref<4xi32, #tpu.memory_space<smem>>
    %4 = arith.index_cast %arg1 : i32 to index
    %5 = memref.load %arg6[%4] : memref<4xi32, #tpu.memory_space<smem>>
    %6 = arith.cmpi slt, %3, %5 : i32
    %7 = arith.extui %6 : i1 to i32
    %8 = arith.muli %arg2, %7 : i32
    %c0_i32 = arith.constant 0 : i32
    return %1, %8 : i32, i32
  }
  func.func @transform_1(%arg0: i32, %arg1: i32, %arg2: i32, %arg3: memref<4xi32, #tpu.memory_space<smem>>, %arg4: memref<4xi32, #tpu.memory_space<smem>>, %arg5: memref<4xi32, #tpu.memory_space<smem>>, %arg6: memref<4xi32, #tpu.memory_space<smem>>) -> (i32, i32, i32) {
    %0 = arith.index_cast %arg1 : i32 to index
    %1 = memref.load %arg3[%0] : memref<4xi32, #tpu.memory_space<smem>>
    %2 = arith.index_cast %arg1 : i32 to index
    %3 = memref.load %arg5[%2] : memref<4xi32, #tpu.memory_space<smem>>
    %4 = arith.index_cast %arg1 : i32 to index
    %5 = memref.load %arg6[%4] : memref<4xi32, #tpu.memory_space<smem>>
    %6 = arith.cmpi slt, %3, %5 : i32
    %7 = arith.extui %6 : i1 to i32
    %8 = arith.muli %arg2, %7 : i32
    %c0_i32 = arith.constant 0 : i32
    return %1, %8, %arg0 : i32, i32, i32
  }
  func.func @transform_2(%arg0: i32, %arg1: i32, %arg2: i32, %arg3: memref<4xi32, #tpu.memory_space<smem>>, %arg4: memref<4xi32, #tpu.memory_space<smem>>, %arg5: memref<4xi32, #tpu.memory_space<smem>>, %arg6: memref<4xi32, #tpu.memory_space<smem>>) -> (i32, i32, i32) {
    %0 = arith.index_cast %arg1 : i32 to index
    %1 = memref.load %arg3[%0] : memref<4xi32, #tpu.memory_space<smem>>
    %c0_i32 = arith.constant 0 : i32
    %c0_i32_0 = arith.constant 0 : i32
    return %1, %c0_i32, %arg0 : i32, i32, i32
  }
  func.func @transform_3(%arg0: i32, %arg1: i32, %arg2: i32, %arg3: memref<4xi32, #tpu.memory_space<smem>>, %arg4: memref<4xi32, #tpu.memory_space<smem>>, %arg5: memref<4xi32, #tpu.memory_space<smem>>, %arg6: memref<4xi32, #tpu.memory_space<smem>>) -> (i32, i32) {
    %0 = arith.index_cast %arg1 : i32 to index
    %1 = memref.load %arg4[%0] : memref<4xi32, #tpu.memory_space<smem>>
    %c0_i32 = arith.constant 0 : i32
    return %1, %arg0 : i32, i32
  }
}

</mosaic_0001>

<bundles_post_ra>
// kernel: tpu_custom_call.1
= control target key start
LH: loop header
LB: loop body
LE: loop exit
PB: predicated region body
PF: predicated region fallthrough
CT: control target
= control target key end

     0   :  { %s1058_s24 = smov [#allocation3]   ;;  %s1484_s0 = inlined_call_operand.hbm [shape: s32[4], index: 0, kind: input, shape index: {}]   ;;  %s1485_s4 = inlined_call_operand.hbm [shape: f32[16,32], index: 4, kind: input, shape index: {}]   ;;  %s1486_s5 = inlined_call_operand.hbm [shape: f32[4,32,128], index: 5, kind: input, shape index: {}]   ;;  %s1487_s6 = inlined_call_operand.vmem [shape: f32[4,1,128], index: 6, kind: input, shape index: {}]   ;;  %s1488_s7 = inlined_call_operand.hbm [shape: f32[16,128], index: 7, kind: output, shape index: {}]   ;;  %s1489_s1 = inlined_call_operand.vmem [shape: s32[4], index: 1, kind: input, shape index: {}]   ;;  %s1490_s2 = inlined_call_operand.vmem [shape: s32[4], index: 2, kind: input, shape index: {}]   ;;  %s1491_s3 = inlined_call_operand.vmem [shape: s32[4], index: 3, kind: input, shape index: {}]  }
   0x1   :  { %1504 = sst [smem:[#allocation28_spill]] %s1488_s7  ;;  %s14_s29 = sshll.u32 %s1489_s1, 4  ;;  %s15_s29 = int_to_ptr.vmem [resolvable:$true] %s14_s29 }
   0x2   :  { %13 = dma.hbm_to_smem %s1484_s0, 16, %s1058_s24, [#allocation2] }
   0x3   :  { %s18_s9 = sshll.u32 %s1490_s2, 4  ;;  %s830_s10 = scalar_lea.vmem %s15_s29, 16  ;;  %s19_s9 = int_to_ptr.vmem [resolvable:$true] %s18_s9 }
   0x4   :  { %p831_p0 = scmp.ne.s32.totalorder %s15_s29, %s830_s10  ;;  %p835_p1 = scmp.lt.s32.totalorder %s15_s29, %s15_s29 }
   0x5   :  { %p836_p2 = scmp.lt.s32.totalorder %s830_s10, %s830_s10 }
   0x7   :  { %p837_p3 = por %p836_p2, %p835_p1 }
   0x9   :  { %p838_p4 = pnand %p837_p3, %p831_p0 }
   0xb   :  { %841 = shalt.err (!%p838_p4)  }
   0xc   :  { %s1059_s11 = smov [#allocation4]   ;;  %s22_s13 = sshll.u32 %s1491_s3, 4  ;;  %s23_s13 = int_to_ptr.vmem [resolvable:$true] %s22_s13 }
   0xd   :  { %17 = dma.vmem_to_smem %s15_s29, 16, %s1059_s11, [#allocation2] }
   0xe   :  { %s842_s1 = scalar_lea.vmem %s19_s9, 16  ;;  %p847_p6 = scmp.lt.s32.totalorder %s19_s9, %s19_s9 }
   0xf   :  { %p843_p5 = scmp.ne.s32.totalorder %s19_s9, %s842_s1  ;;  %p848_p7 = scmp.lt.s32.totalorder %s842_s1, %s842_s1 }
  0x11   :  { %p849_p8 = por %p848_p7, %p847_p6 }
  0x13   :  { %p850_p9 = pnand %p849_p8, %p843_p5 }
  0x15   :  { %853 = shalt.err (!%p850_p9)  }
  0x16   :  { %s1060_s2 = smov [#allocation5]   ;;  %s854_s14 = scalar_lea.vmem %s23_s13, 16 }
  0x17   :  { %21 = dma.vmem_to_smem %s19_s9, 16, %s1060_s2, [#allocation2] }
  0x18   :  { %p855_p10 = scmp.ne.s32.totalorder %s23_s13, %s854_s14  ;;  %p859_p11 = scmp.lt.s32.totalorder %s23_s13, %s23_s13 }
  0x19   :  { %p860_p12 = scmp.lt.s32.totalorder %s854_s14, %s854_s14 }
  0x1b   :  { %p861_p13 = por %p860_p12, %p859_p11 }
  0x1d   :  { %p862_p0 = pnand %p861_p13, %p855_p10 }
  0x1f   :  { %865 = shalt.err (!%p862_p0)  }
  0x20   :  { %s1061_s15 = smov [#allocation6]  }
  0x21   :  { %25 = dma.vmem_to_smem %s23_s13, 16, %s1061_s15, [#allocation2] }
  0x22   :  { %996 = dma.done.wait [#allocation2], 64 }
  0x23   :  { %997 = vsyncadd [#allocation2], 4294967232 }
  0x24   :  { %27 = sfence }
  0x25   :  { %28 = vsyncpa [#allocation8], 0 }
  0x26   :  { %30 = vsyncpa [#allocation8 + $0x1], 0 }
  0x27   :  { %31 = vsyncpa [#allocation11], 0 }
  0x28   :  { %33 = vsyncpa [#allocation11 + $0x1], 0 }
  0x29   :  { %34 = vsyncpa [#allocation9], 0 }
  0x2a   :  { %36 = vsyncpa [#allocation9 + $0x1], 0  ;;  %s1121_s3 = smov 0   ;;  %s1123_s16 = smov 0  }
  0x2b   :  { %s1125_s17 = smov 0   ;;  %s1127_s18 = smov 0  }
  0x2c   :  { %s1129_s19 = smov 0   ;;  %s1131_s20 = smov 0  }
  0x2d   :  { %s1133_s21 = smov 0   ;;  %s1135_s22 = smov 0  }
  0x2e   :  { %s1137_s23 = smov 0   ;;  %s1139_s24 = smov 0  }
  0x2f   :  { %s1141_s25 = smov 0   ;;  %s1143_s26 = smov 0  }
  0x30 LB: > { %1505 = sst [smem:[#allocation22_spill]] %s1012_s3  ;;  %s645_s27 = sadd.s32 4294967295, %s1056_s26   ;;  %s1056_s26 = sphi %s1143_s26, %s42_s26   ;;  %s1052_s25 = sphi %s1141_s25, %s1547_s25   ;;  %s1048_s24 = sphi %s1139_s24, %s1546_s24   ;;  %s1044_s23 = sphi %s1137_s23, %s1537_s23   ;;  %s1040_s22 = sphi %s1135_s22, %s1545_s22   ;;  %s1036_s21 = sphi %s1133_s21, %s1544_s21   ;;  %s1032_s20 = sphi %s1131_s20, %s1543_s20   ;;  %s1028_s19 = sphi %s1129_s19, %s1542_s19   ;;  %s1024_s18 = sphi %s1127_s18, %s1541_s18   ;;  %s1020_s17 = sphi %s1125_s17, %s1535_s17   ;;  %s1016_s16 = sphi %s1123_s16, %s1540_s16   ;;  %s1012_s3 = sphi %s1121_s3, %s1539_s3  }
  0x31   : > { %1506 = sst [smem:[#allocation23_spill]] %s1020_s17  ;;  %s646_s28 = sadd.s32 4294967294, %s1056_s26  }
  0x32   : > { %1507 = sst [smem:[#allocation24_spill]] %s1044_s23  ;;  %s57_s29 = sadd.s32 1, %s1052_s25 }
  0x33   : > { %s65_s30 = sld [smem:[#allocation4 + %s1052_s25]]  ;;  %p59_p1 = scmp.ge.s32.totalorder %s57_s29, 4 }
  0x34   : > { %s82_s8 = sadd.s32 1, %s1044_s23  ;;  %p89_p2 = scmp.ne.s32.totalorder %s1044_s23, %s1040_s22 }
  0x35   : > { %p1497_p3 = scmp.eq.s32.totalorder %s1056_s26, 0  ;;  %s1549_s29 = smov (%p59_p1, %s57_s29), 0 }
  0x36   : > { %1508 = sst [smem:[#allocation25_spill]] %s1549_s29  ;;  %p95_p5 = scmp.ne.s32.totalorder %s1040_s22, %s1036_s21 }
  0x37   : > { %p1191_p4 = por %p1497_p3, %p89_p2  ;;  %s71_s10 = sld [smem:[#allocation4 + %s1549_s29]] }
  0x38   : > { %p1197_p6 = scmp.eq.s32.totalorder %s645_s27, 0  ;;  %s177_s0 = sld [smem:[#allocation4 + %s1052_s25]] }
  0x39   : > { %s184_s12 = sadd.s32 1, %s1020_s17  ;;  %s178_s1 = sld [smem:[#allocation4 + %s1549_s29]] }
  0x3a   : > { %s1510_s11 = scalar_select %p1197_p6, 1, 0 }
  0x3b   : > { %p1205_p7 = por %p1197_p6, %p95_p5  ;;  %p194_p8 = scmp.ne.s32.totalorder %s1020_s17, %s1016_s16 }
  0x3c   : > { %p195_p9 = scmp.eq.s32.totalorder %s645_s27, 3  ;;  %p200_p10 = scmp.ne.s32.totalorder %s1016_s16, %s1012_s3 }
  0x3d   : > { %s1511_s13 = scalar_select %p1205_p7, 1, 0 }
  0x3e   : > { %p201_p11 = scmp.eq.s32.totalorder %s646_s28, 3  ;;  %p1214_p12 = por %p195_p9, %p194_p8 }
  0x3f   : > { %s77_s14 = ssub.s32 %s65_s30, %s71_s10  ;;  %p1496_p1 = scmp.lt.s32.totalorder %s1056_s26, 4 }
  0x40   : > { %s1512_s2 = scalar_select %p1214_p12, 1, 0 }
  0x41   : > { %p1218_p13 = por %p201_p11, %p200_p10  ;;  %p80_p0 = scmp.eq.s32.totalorder %s77_s14, 0 }
  0x42   : > { %s179_s21 = ssub.s32 %s177_s0, %s178_s1  ;;  %s221_s27 = sand.u32 1, %s1044_s23  }
  0x43   : > { %s1513_s15 = scalar_select %p1218_p13, 1, 0 }
  0x44   : > { %s1225_s7 = scalar_select %p80_p0, %s1044_s23, %s82_s8  }
  0x45   : > { %p182_p2 = scmp.eq.s32.totalorder %s179_s21, 0  ;;  %s649_s28 = sshll.u32 %s221_s27, 4 }
  0x46   : > { %1514 = sst [smem:[#allocation26_spill]] %s1225_s7  ;;  %p1231_p5 = pnand %p1496_p1, %p1191_p4 }
  0x47   : > { %s1236_s30 = scalar_select %p182_p2, %s1020_s17, %s184_s12  }
  0x48   : > { %s689_s10 = scalar_select %p1191_p4, [#allocation4], [#allocation13] }
  0x49   : > { %1516 = sst [smem:[#allocation27_spill]] %s1236_s30  ;;  %s225_s8 = scalar_lea.vmem [#allocation7], %s649_s28 }
  0x4a   : > { %s690_s0 = scalar_select %p1191_p4, %s1052_s25, 0 }
  0x4b   : > { %s1551_s10 = smov (!%p1496_p1, %s689_s10), [#allocation16]  ;;  %s239_s1 = sshll.u32 %s225_s8, 4  ;;  %s1247_s1 = int_to_ptr.vmem [resolvable:$true] %s239_s1 }
  0x4c   : > { %s1553_s0 = smov (!%p1496_p1, %s690_s0), 0  ;;  %p655_p8 = scmp.ge.s32.totalorder %s1056_s26, 1 }
  0x4d   : > { %s226_s14 = sld [smem:[%s1551_s10 + %s1553_s0]]  ;;  %p288_p9 = scmp.lt.s32.totalorder %s1056_s26, 5 }
  0x4e   : > { %s1256_s7 = sld [smem:[#allocation3 + %s1052_s25]]  ;;  %s1266_s10 = scalar_lea.sflag [#allocation8], %s221_s27 }
  0x4f   : > { %p1251_p10 = pnand %p655_p8, %p288_p9  ;;  %s1264_s28 = sld [smem:[#allocation3 + %s1549_s29]] }
  0x50   : > { %p868_p11 = pneg %p1231_p5  ;;  %s871_s17 = scalar_lea.hbm %s1485_s4, 256 }
  0x51   : > { %s1517_s21 = scalar_select %p1251_p10, 1, 0 }
  0x53   : > { %s669_s12 = sshll.u32 %s226_s14, 8 }
  0x54   : > { %s1261_s30 = scalar_lea.hbm %s1485_s4, %s669_s12 }
  0x55   : > { %s866_s0 = scalar_lea.hbm %s1261_s30, 256  ;;  %p872_p8 = scmp.lt.s32.totalorder %s1261_s30, %s1485_s4 }
  0x56   : > { %p867_p4 = scmp.ne.s32.totalorder %s1261_s30, %s866_s0  ;;  %p873_p9 = scmp.lt.s32.totalorder %s871_s17, %s866_s0 }
  0x58   : > { %p869_p0 = pnand %p868_p11, %p867_p4  ;;  %p874_p1 = por %p873_p9, %p872_p8 }
  0x5a   : > { %p870_p2 = pneg %p869_p0 }
  0x5c   : > { %p875_p3 = pnand %p874_p1, %p870_p2 }
  0x5e   : > { %878 = shalt.err (!%p875_p3)
}
  0x5f   : > { %s879_s27 = scalar_lea.vmem %s1247_s1, 256  ;;  %s1062_s9 = smov [#allocation7]  }
  0x60   : > { %p880_p13 = scmp.ne.s32.totalorder %s1247_s1, %s879_s27  ;;  %s884_s29 = sshll.u32 %s1062_s9, 4  ;;  %s885_s29 = int_to_ptr.vmem [resolvable:$false] %s884_s29 }
  0x61   : > { %s886_s8 = scalar_lea.vmem %s885_s29, 512  ;;  %p887_p0 = scmp.lt.s32.totalorder %s1247_s1, %s885_s29 }
  0x62   : > { %p882_p12 = pnand %p880_p13, %p868_p11  ;;  %p888_p7 = scmp.lt.s32.totalorder %s886_s8, %s879_s27 }
  0x64   : > { %p883_p4 = pneg %p882_p12  ;;  %p889_p10 = por %p888_p7, %p887_p0 }
  0x66   : > { %p890_p6 = pnand %p889_p10, %p883_p4 }
  0x68   : > { %893 = shalt.err (!%p890_p6)
}
  0x69   : > { %s1502_s17 = smov 128   ;;  %s1064_s29 = smov 8  }
  0x6a   : > { %706 = dma.hbm_to_vmem [thread:$0]  (!%p1231_p5), %s1261_s30, 256, %s1247_s1, %s1266_s10, %s1502_s17, %s1502_s17, %s1064_s29  }
  0x6b   : > { %p131_p3 = scmp.ne.s32.totalorder %s1032_s20, %s1028_s19  ;;  %p137_p6 = scmp.ne.s32.totalorder %s1028_s19, %s1024_s18 }
  0x6c   : > { %p1518_p7 = scmp.eq.s32.totalorder %s1056_s26, 0  ;;  %s249_s0 = sand.u32 1, %s1032_s20  }
  0x6d   : > { %p1519_p13 = scmp.ne.s32.totalorder %s1510_s11, 0  ;;  %s117_s23 = ssub.s32 %s1256_s7, %s1264_s28 }
  0x6e   : > { %p133_p12 = por %p131_p3, %p1518_p7  ;;  %s124_s12 = sadd.s32 1, %s1032_s20 }
  0x6f   : > { %p1299_p1 = por %p137_p6, %p1519_p13  ;;  %p122_p10 = scmp.eq.s32.totalorder %s117_s23, 0 }
  0x70   : > { %s652_s27 = sshll.u32 %s249_s0, 5  ;;  %p1521_p11 = scmp.lt.s32.totalorder %s1056_s26, 4 }
  0x71   : > { %s1520_s14 = scalar_select %p1299_p1, 1, 0 }
  0x72   : > { %s692_s3 = scalar_select %p133_p12, [#allocation3], [#allocation14] }
  0x73   : > { %s1307_s9 = scalar_select %p122_p10, %s1032_s20, %s124_s12  }
  0x74   : > { %s693_s8 = scalar_select %p133_p12, %s1052_s25, 0 }
  0x75   : > { %s1555_s3 = smov (!%p1521_p11, %s692_s3), [#allocation17]  ;;  %p1522_p5 = pmov %p1521_p11 }
  0x76   : > { %s253_s30 = scalar_lea.vmem [#allocation10], %s652_s27  ;;  %s1327_s12 = scalar_lea.sflag [#allocation11], %s249_s0 }
  0x77   : > { %s1557_s8 = smov (!%p1522_p5, %s693_s8), 0  ;;  %p1523_p2 = pmov %p1522_p5 }
  0x78   : > { %s254_s11 = sld [smem:[%s1555_s3 + %s1557_s8]]  ;;  %s269_s7 = sshll.u32 %s253_s30, 4  ;;  %s1320_s7 = int_to_ptr.vmem [resolvable:$true] %s269_s7 }
  0x79   : > { %p1316_p8 = pnand %p1523_p2, %p133_p12  ;;  %s899_s8 = scalar_lea.hbm %s1486_s5, 2048 }
  0x7b   : > { %p896_p4 = pneg %p1316_p8 }
  0x7e   : > { %s670_s1 = sshll.u32 %s254_s11, 9 }
  0x7f   : > { %s1325_s23 = scalar_lea.hbm %s1486_s5, %s670_s1 }
  0x80   : > { %s894_s17 = scalar_lea.hbm %s1325_s23, 512  ;;  %p900_p6 = scmp.lt.s32.totalorder %s1325_s23, %s1486_s5 }
  0x81   : > { %p895_p9 = scmp.ne.s32.totalorder %s1325_s23, %s894_s17  ;;  %p901_p7 = scmp.lt.s32.totalorder %s899_s8, %s894_s17 }
  0x83   : > { %p897_p0 = pnand %p896_p4, %p895_p9  ;;  %p902_p12 = por %p901_p7, %p900_p6 }
  0x85   : > { %p898_p3 = pneg %p897_p0 }
  0x87   : > { %p903_p13 = pnand %p902_p12, %p898_p3 }
  0x89   : > { %906 = shalt.err (!%p903_p13)
}
  0x8a   : > { %s907_s0 = scalar_lea.vmem %s1320_s7, 512  ;;  %s1065_s1 = smov [#allocation10]  }
  0x8b   : > { %p908_p10 = scmp.ne.s32.totalorder %s1320_s7, %s907_s0  ;;  %s912_s28 = sshll.u32 %s1065_s1, 4  ;;  %s913_s28 = int_to_ptr.vmem [resolvable:$false] %s912_s28 }
  0x8c   : > { %s914_s10 = scalar_lea.vmem %s913_s28, 1024  ;;  %p915_p2 = scmp.lt.s32.totalorder %s1320_s7, %s913_s28 }
  0x8d   : > { %p910_p11 = pnand %p908_p10, %p896_p4  ;;  %p916_p9 = scmp.lt.s32.totalorder %s914_s10, %s907_s0 }
  0x8f   : > { %p911_p5 = pneg %p910_p11  ;;  %p917_p0 = por %p916_p9, %p915_p2 }
  0x91   : > { %p918_p1 = pnand %p917_p0, %p911_p5 }
  0x93   : > { %921 = shalt.err (!%p918_p1)
}
  0x94   : > { %s1525_s17 = smov 128   ;;  %p1526_p4 = scmp.ne.s32.totalorder %s1517_s21, 0 }
  0x95   : > { %711 = dma.hbm_to_vmem [thread:$0]  (!%p1316_p8), %s1325_s23, 512, %s1320_s7, %s1327_s12, %s1525_s17, %s1525_s17, %s1064_s29  }
  0x96   : > { %292 = sbr.rel (%p1526_p4) target bundleno = 416 (0x1a0), region = 32  ;;  %s294_s27 = sand.u32 (!%p1526_p4), 1, %s1040_s22  }
  0x97   : > { %s1354_s3 = sshll.u32 (!%p1526_p4), %s294_s27, 4  ;;  %s295_s8 = scalar_lea.sflag (!%p1526_p4), [#allocation8], %s294_s27 }
  0x98   : > { %s298_s11 = scalar_lea.vmem (!%p1526_p4), [#allocation7], %s1354_s3  ;;  %p1527_p1 = scmp.ne.s32.totalorder (!%p1526_p4), %s1511_s13, 0 }
  0x9b   : > { %999 = dma.done.wait (%p1527_p1), %s295_s8, 256  }
  0x9c   : > { %1001 = vsyncadd (%p1527_p1), %s295_s8, 4294967040  ;;  %s303_s18 = sand.u32 1, %s1028_s19   ;;  %p1528_p8 = scmp.ne.s32.totalorder %s1520_s14, 0 }
  0x9d   : > { %s657_s29 = sshll.u32 %s303_s18, 5  ;;  %s304_s7 = scalar_lea.sflag [#allocation11], %s303_s18 }
  0x9e   : > { %s307_s21 = scalar_lea.vmem [#allocation10], %s657_s29 }
  0x9f   : > { %1003 = dma.done.wait (%p1528_p8), %s304_s7, 512  }
  0xa0   : > { %1005 = vsyncadd (%p1528_p8), %s304_s7, 4294966784  ;;  %s339_s23 = sand.u32 1, %s1016_s16   ;;  %s356_s13 = sld [smem:[#allocation3 + %s1048_s24]] }
  0xa1   : > { %s658_s12 = sshll.u32 %s339_s23, 4  ;;  %s1371_s30 = sld [smem:[#allocation5 + %s1048_s24]] }
  0xa2   : > { %s1374_s0 = sld [smem:[#allocation6 + %s1048_s24]]  ;;  %s1380_s17 = scalar_lea.vmem [#allocation12], %s658_s12 }
  0xa3   : > { %s368_s1 = sld [smem:[#allocation4 + %s1048_s24]] }
  0xa6   : > { %p357_p3 = scmp.lt.s32.totalorder %s356_s13, 3 }
  0xa8   : > { %s1559_s13 = smov (!%p357_p3, %s356_s13), 3  ;;  %p659_p6 = scmp.ge.s32.totalorder %s1371_s30, %s1374_s0 }
  0xa9   : > { %s362_s10 = scalar_lea.vmem %s1487_s6, %s1559_s13  ;;  %s663_s27 = sshll.u32 (!%p659_p6), %s368_s1, 4 }
  0xaa   : > { %372 = sbr.rel (%p659_p6) target bundleno = 389 (0x185), region = 44  ;;  %s470_s8 = sadd.s32 (!%p659_p6), 16, %s663_s27 }
  0xab   : > { %p469_p7 = scmp.gt.s32.totalorder (!%p659_p6), %s1371_s30, %s663_s27  ;;  %p471_p12 = scmp.lt.s32.totalorder (!%p659_p6), %s1374_s0, %s470_s8 }
  0xad   : > { %p1390_p13 = por (!%p659_p6), %p471_p12, %p469_p7 }
  0xaf   : > { %v378_v0 = vld [vmem:[%s307_s21 + $0x18] sm:$0xff]  ;;  %v377_v1 = vld [vmem:[%s307_s21 + $0x10] sm:$0xff]  ;;  %vm386_vm0 = vcmask 261120   ;;  %v376_v3 = vld [vmem:[%s307_s21 + $0x8] sm:$0xff]  ;;  %v476_v11 = vlaneseq (%p1390_p13)  ;;  %v479_v12 = vstv (%p1390_p13), %s663_s27 }
  0xb0   : > { %678 = vmatprep.subr.mxu0 %v378_v0  ;;  %v373_v2 = vld [vmem:[%s298_s11] sm:$0xff]  ;;  %v374_v5 = vld [vmem:[%s298_s11 + $0x8] sm:$0xff]  ;;  %v482_v14 = vstv (%p1390_p13), %s1371_s30  ;;  %v485_v15 = vstv (%p1390_p13), %s1374_s0 }
  0xb1   : > { %679 = vmatpush3.msra.mxu0 %v378_v0  ;;  %686 = vmatprep.mubr.msk.f32.mxu0 %vm386_vm0, %v373_v2  ;;  %v375_v4 = vld [vmem:[%s307_s21] sm:$0xff]  ;;  %v660_v6 = vld [vmem:[%s362_s10] ss:$0 sm:$0xff]  ;;  %v477_v13 = vshrl.u32 (%p1390_p13), %v476_v11, 7 }
  0xb2   : > { %680 = vmatprep.subr.mxu0 %v377_v1  ;;  %v490_v18 = vld [vmem:[%s1380_s17] sm:$0xff] (%p1390_p13)  ;;  %v491_v20 = vld [vmem:[%s1380_s17 + $0x8] sm:$0xff] (%p1390_p13) }
  0xb3   : > { %681 = vmatpush3.msra.mxu0 %v377_v1  ;;  %v480_v16 = vadd.s32 (%p1390_p13), %v479_v12, %v477_v13  ;;  %v478_v17 = vadd.s32 (%p1390_p13), 8, %v477_v13 }
  0xb4   : > { %682 = vmatprep.subr.mxu0 %v376_v3 }
  0xb5   : > { %683 = vmatpush3.msra.mxu0 %v376_v3  ;;  %vm483_vm1 = vcmp.ge.s32.totalorder (%p1390_p13), %v480_v16, %v482_v14  ;;  %vm486_vm2 = vcmp.lt.s32.totalorder (%p1390_p13), %v480_v16, %v485_v15  ;;  %v481_v19 = vadd.s32 (%p1390_p13), %v479_v12, %v478_v17 }
  0xb6   : > { %684 = vmatprep.subr.mxu0 %v375_v4  ;;  %vm488_vm3 = vmand (%p1390_p13), %vm483_vm1, %vm486_vm2 }
  0xb7   : > { %685 = vmatpush3.msra.mxu0 %v375_v4  ;;  %vm484_vm4 = vcmp.ge.s32.totalorder (%p1390_p13), %v481_v19, %v482_v14  ;;  %vm487_vm5 = vcmp.lt.s32.totalorder (%p1390_p13), %v481_v19, %v485_v15 }
  0xb8   : > { %687 = vmatmul.mubr.msk.f32.vlgmr.msra.gmra.mxu0 %vm386_vm0, %v374_v5  ;;  %vm489_vm6 = vmand (%p1390_p13), %vm484_vm4, %vm487_vm5 }
 0x177   : > { %475 = sbr.rel (!%p1390_p13) target bundleno = 383 (0x17f), region = 48 }
 0x178   : > { %v688_v7 = vpop.f32.mrf.mxu0 }
 0x179   : > { %v465_v8 = vadd.f32 %v688_v7, %v660_v6 }
 0x17a   : > { %v459_v9 = vpop.f32.mrf.mxu0 }
 0x17b   : > { %v460_v10 = vadd.f32 %v660_v6, %v459_v9  ;;  %v497_v22 = vsel (%p1390_p13), %vm489_vm6, %v465_v8, %v491_v20 }
 0x17c   : > { %499 = vst [vmem:[%s1380_s17 + $0x8] sm:$0xff] %v497_v22 }
 0x17d   : > { %v496_v21 = vsel %vm488_vm3, %v460_v10, %v490_v18 }
 0x17e   : > { %498 = vst [vmem:[%s1380_s17] sm:$0xff] %v496_v21 }
 0x17f PF: > { %502 = sbr.rel (%p1390_p13) target bundleno = 389 (0x185), region = 52 }
 0x184   : > { %503 = vst [vmem:[%s1380_s17] sm:$0xff] %v460_v10  ;;  %504 = vst [vmem:[%s1380_s17 + $0x8] sm:$0xff] %v465_v8 }
 0x185 PF: > { %p1530_p10 = scmp.ne.s32.totalorder %s1512_s2, 0  ;;  %s521_s29 = sshll.u32 %s1380_s17, 4  ;;  %s1412_s29 = int_to_ptr.vmem [resolvable:$true] %s521_s29 }
 0x186   : > { %s1531_s12 = sld [smem:[#allocation28_spill]]  ;;  %s1421_s0 = scalar_lea.sflag [#allocation9], %s339_s23 }
 0x187   : > { %s697_s3 = scalar_select %p1530_p10, [#allocation4], [#allocation15] }
 0x188   : > { %s1561_s24 = smov (!%p1530_p10, %s1048_s24), 0  ;;  %s922_s1 = scalar_lea.vmem %s1412_s29, 256 }
 0x189   : > { %s513_s11 = sld [smem:[%s697_s3 + %s1561_s24]]  ;;  %p923_p11 = scmp.ne.s32.totalorder %s1412_s29, %s922_s1 }
 0x18a   : > { %s1066_s24 = smov [#allocation12]  }
 0x18b   : > { %p924_p5 = pnand %p923_p11, %p1530_p10  ;;  %s926_s28 = sshll.u32 %s1066_s24, 4  ;;  %s927_s28 = int_to_ptr.vmem [resolvable:$false] %s926_s28 }
 0x18c   : > { %s928_s14 = scalar_lea.vmem %s927_s28, 512  ;;  %p929_p9 = scmp.lt.s32.totalorder %s1412_s29, %s927_s28 }
 0x18d   : > { %p925_p2 = pneg %p924_p5  ;;  %p930_p0 = scmp.lt.s32.totalorder %s928_s14, %s922_s1 }
 0x18f   : > { %s671_s7 = sshll.u32 %s513_s11, 8  ;;  %p931_p4 = por %p930_p0, %p929_p9 }
 0x190   : > { %s1417_s30 = scalar_lea.hbm %s1531_s12, %s671_s7 }
 0x191   : > { %p932_p1 = pnand %p931_p4, %p925_p2 }
 0x193   : > { %935 = shalt.err (!%p932_p1)
}
 0x194   : > { %s936_s23 = scalar_lea.hbm %s1417_s30, 256  ;;  %s940_s27 = scalar_lea.hbm %s1531_s12, 256 }
 0x195   : > { %p937_p8 = scmp.ne.s32.totalorder %s1417_s30, %s936_s23  ;;  %p941_p7 = scmp.lt.s32.totalorder %s1417_s30, %s1531_s12 }
 0x196   : > { %p942_p12 = scmp.lt.s32.totalorder %s940_s27, %s936_s23 }
 0x197   : > { %p938_p3 = pnand %p937_p8, %p1530_p10 }
 0x198   : > { %p943_p13 = por %p942_p12, %p941_p7 }
 0x199   : > { %p939_p6 = pneg %p938_p3 }
 0x19b   : > { %p944_p11 = pnand %p943_p13, %p939_p6 }
 0x19d   : > { %947 = shalt.err (!%p944_p11)
}
 0x19e   : > { %s1067_s3 = smov 128   ;;  %s1068_s11 = smov 8  }
 0x19f   : > { %699 = dma.vmem_to_hbm [thread:$0]  (%p1530_p10), %s1412_s29, 256, %s1417_s30, %s1421_s0, %s1067_s3, %s1067_s3, %s1068_s11  }
 0x1a0 PF: > { %s1532_s7 = sld [smem:[#allocation22_spill]]  ;;  %p717_p5 = scmp.ge.s32.totalorder %s1056_s26, 2 }
 0x1a1   : > { %p1533_p2 = scmp.ne.s32.totalorder %s1513_s15, 0 }
 0x1a3   : > { %p713_p9 = pnand %p717_p5, %p1533_p2 }
 0x1a5   : > { %p714_p0 = pneg %p713_p9 }
 0x1a6   : > { %s536_s21 = sand.u32 1, %s1532_s7  }
 0x1a7   : > { %s537_s13 = scalar_lea.sflag [#allocation9], %s536_s21 }
 0x1a8   : > { %1007 = dma.done.wait (%p714_p0), %s537_s13, 256  }
 0x1a9   : > { %1009 = vsyncadd (%p714_p0), %s537_s13, 4294967040  ;;  %s42_s26 = sadd.s32 1, %s1056_s26   ;;  %s1534_s1 = sld [smem:[#allocation23_spill]] }
 0x1aa   : > { %p39_p4 = scmp.ge.s32.totalorder %s42_s26, 6   ;;  %s1535_s17 = sld [smem:[#allocation27_spill]] }
 0x1ab   : > { %s1536_s2 = sld [smem:[#allocation24_spill]]  ;;  %s1539_s3 = smov %s1016_s16 }
 0x1ac   : > { %s1537_s23 = sld [smem:[#allocation26_spill]]  ;;  %s1541_s18 = smov %s1028_s19 }
 0x1ad   : > { %s1538_s29 = sld [smem:[#allocation25_spill]]  ;;  %s1542_s19 = smov %s1032_s20 }
 0x1ae   : > { %s1543_s20 = smov %s1307_s9  ;;  %s1544_s21 = smov %s1040_s22 }
 0x1af   : > { %s1540_s16 = smov %s1534_s1  ;;  %s1546_s24 = smov %s1052_s25 }
 0x1b0   :  { %41 = sbr.rel (!%p39_p4) target bundleno = 48 (0x30), region = 105 }
 0x1b1   : > { %s1545_s22 = smov %s1536_s2 }
 0x1b3   : > { %s1547_s25 = smov %s1538_s29 }
 0x1b5   :  { %542 = vsyncpa [#allocation8], 1 }
 0x1b6   :  { %544 = vsyncpa [#allocation8 + $0x1], 1 }
 0x1b7   :  { %545 = vsyncpa [#allocation11], 1 }
 0x1b8   :  { %547 = vsyncpa [#allocation11 + $0x1], 1 }
 0x1b9   :  { %548 = vsyncpa [#allocation9], 1 }
 0x1ba   :  { %550 = vsyncpa [#allocation9 + $0x1], 1 }

</bundles_post_ra>
